<compile_context>
chip_gen: v5e
topology: v5e:2x2
jax: 0.10.0
libtpu: 0.0.40
codegen_flags: <defaults>
</compile_context>

<pallas_src>
import numpy as np

import jax
import jax.numpy as jnp
from jax.experimental import pallas as pl
from jax.experimental.pallas import tpu as pltpu

D = 4        # number of cosine terms (matches `d = 4` in the PyTorch script)
_LANES = 128


def _round_up(x, m):
    return ((x + m - 1) // m) * m


def _cheb_to_monomial_matrix(d):
    """M[i, j] = coefficient of x^j in the Chebyshev polynomial T_i(x).

    cos(i*t) == T_i(cos t), so  y = sum_i a[i]*cos(i*t) = P(cos t) with
    monomial coefficients b = M^T @ a. Exact and well-conditioned for small d.
    """
    M = np.zeros((d, d), dtype=np.float64)
    M[0, 0] = 1.0
    if d > 1:
        M[1, 1] = 1.0
    for i in range(2, d):
        M[i, 1:] = 2.0 * M[i - 1, :-1]     # 2 x * T_{i-1}
        M[i, :] -= M[i - 2, :]             # - T_{i-2}
    return M


def _make_cos_series_kernel(d):
    """o = P(cos(t)), Horner evaluation of the degree-(d-1) monomial poly."""

    def kernel(b_ref, t_ref, o_ref):
        # b_ref : SMEM (d,) float32 monomial coefficients
        # t_ref / o_ref : VMEM (block_rows, 128) float32 tile
        t = t_ref[...]

        if d == 1:
            # y = a[0] everywhere (cos(0*t) == 1); no transcendental needed.
            o_ref[...] = jnp.full_like(t, b_ref[0])
            return

        # Single transcendental per element (EUP/VPU range-reduction).
        c = jnp.cos(t)

        # Horner with the init folded into the first step:
        #   acc = b[d-1]*c + b[d-2]; acc = acc*c + b[j] ...
        acc = b_ref[d - 1] * c + b_ref[d - 2]
        for j in range(d - 3, -1, -1):
            acc = acc * c + b_ref[j]

        o_ref[...] = acc

    return kernel


def cos_series(t, a, *, block_rows=2048, min_steps=4):
    """y[k] = sum_i a[i] * cos(i * t[k]); t: (n,), a: (d,). Any n >= 1, d >= 1."""
    (n,) = t.shape
    (d,) = a.shape
    if d < 1:
        raise ValueError("cos_series requires d >= 1")

    # Chebyshev -> monomial coefficients, computed once (tiny, outside kernel).
    M = jnp.asarray(_cheb_to_monomial_matrix(d), dtype=jnp.float32)
    b = M.T @ a.astype(jnp.float32)          # (d,)

    # Lane-dense 2-D layout: rows of 128 lanes. Only the <=127-element lane
    # tail is padded; when n % 128 == 0 the reshape is a pure bitcast.
    rows = pl.cdiv(n, _LANES)
    pad = rows * _LANES - n

    t_flat = t.astype(jnp.float32)
    if pad:
        t_flat = jnp.pad(t_flat, (0, pad))
    t2d = t_flat.reshape(rows, _LANES)

    # Block height: multiple of 8 sublanes, capped at `block_rows`, and capped
    # so the grid keeps >= `min_steps` steps for medium/large inputs (keeps
    # both v7x TensorCores busy on the "parallel" axis). Never bigger than the
    # whole input.
    br = min(block_rows, max(256, _round_up(pl.cdiv(rows, min_steps), 8)))
    br = min(br, _round_up(rows, 8))
    br = max(8, (br // 8) * 8)

    num_blocks = pl.cdiv(rows, br)            # partial last block is masked

    kernel = _make_cos_series_kernel(d)

    out2d = pl.pallas_call(
        kernel,
        out_shape=jax.ShapeDtypeStruct((rows, _LANES), jnp.float32),
        grid=(num_blocks,),
        in_specs=[
            pl.BlockSpec(memory_space=pltpu.MemorySpace.SMEM),  # b: whole (d,)
            pl.BlockSpec((br, _LANES), lambda r: (r, 0)),       # t tile
        ],
        out_specs=pl.BlockSpec((br, _LANES), lambda r: (r, 0)),
        compiler_params=pltpu.CompilerParams(
            dimension_semantics=("parallel",),
        ),
    )(b, t2d)

    out = out2d.reshape(rows * _LANES)
    if pad:
        out = out[:n]
    return out


if __name__ == "__main__":
    key = jax.random.PRNGKey(0)
    ka, kt, kt2 = jax.random.split(key, 3)

    # Shapes from the PyTorch script: d = 4, n = 1000.
    a = jax.random.normal(ka, (D,), dtype=jnp.float32)
    t = (jax.random.uniform(kt, (1000,), dtype=jnp.float32) * 2.0 - 1.0) * 3.14159

    y = jax.block_until_ready(cos_series(t, a))
    y_ref = sum(a[i] * jnp.cos(i * t) for i in range(D))
    assert y.shape == t.shape
    assert jnp.allclose(y, y_ref, atol=1e-5, rtol=1e-5)

    # Second check: larger n exercising multi-step grid, the >=4-step cap and
    # the partial last block / lane-tail padding path.
    t2 = (jax.random.uniform(kt2, (200_000,), dtype=jnp.float32) * 2.0 - 1.0) * 3.14159
    y2 = jax.block_until_ready(cos_series(t2, a))
    y2_ref = sum(a[i] * jnp.cos(i * t2) for i in range(D))
    assert y2.shape == t2.shape
    assert jnp.allclose(y2, y2_ref, atol=1e-5, rtol=1e-5)

    print("KERNEL_OK")
</pallas_src>

<mosaic_0001>
module attributes {stable_mosaic.version = 11 : i64} {
  func.func @kernel(%arg0: i32, %arg1: memref<4xf32, #tpu.memory_space<smem>>, %arg2: memref<8x128xf32, #tpu.memory_space<vmem>>, %arg3: memref<8x128xf32, #tpu.memory_space<vmem>>) attributes {dimension_semantics = [#tpu.dimension_semantics<parallel>], iteration_bounds = array<i64: 1>, scalar_prefetch = 0 : i64, scratch_operands = 0 : i64, tpu.core_type = #tpu.core_type<tc>, window_params = [{transform_indices = @transform_0, window_bounds = array<i64: 4>}, {transform_indices = @transform_1, window_bounds = array<i64: 8, 128>}, {transform_indices = @transform_2, window_bounds = array<i64: 8, 128>}]} {
    %c0 = arith.constant 0 : index
    %c0_0 = arith.constant 0 : index
    %0 = vector.load %arg2[%c0, %c0_0] : memref<8x128xf32, #tpu.memory_space<vmem>>, vector<8x128xf32>
    %1 = math.cos %0 : vector<8x128xf32>
    %c3 = arith.constant 3 : index
    %2 = memref.load %arg1[%c3] : memref<4xf32, #tpu.memory_space<smem>>
    %3 = vector.broadcast %2 : f32 to vector<8x128xf32>
    %4 = arith.mulf %3, %1 : vector<8x128xf32>
    %c2 = arith.constant 2 : index
    %5 = memref.load %arg1[%c2] : memref<4xf32, #tpu.memory_space<smem>>
    %6 = vector.broadcast %5 : f32 to vector<8x128xf32>
    %7 = arith.addf %4, %6 : vector<8x128xf32>
    %8 = arith.mulf %7, %1 : vector<8x128xf32>
    %c1 = arith.constant 1 : index
    %9 = memref.load %arg1[%c1] : memref<4xf32, #tpu.memory_space<smem>>
    %10 = vector.broadcast %9 : f32 to vector<8x128xf32>
    %11 = arith.addf %8, %10 : vector<8x128xf32>
    %12 = arith.mulf %11, %1 : vector<8x128xf32>
    %c0_1 = arith.constant 0 : index
    %13 = memref.load %arg1[%c0_1] : memref<4xf32, #tpu.memory_space<smem>>
    %14 = vector.broadcast %13 : f32 to vector<8x128xf32>
    %15 = arith.addf %12, %14 : vector<8x128xf32>
    %c0_2 = arith.constant 0 : index
    %c0_3 = arith.constant 0 : index
    %16 = vector.load %arg3[%c0_2, %c0_3] : memref<8x128xf32, #tpu.memory_space<vmem>>, vector<8x128xf32>
    tpu.vector_store %arg3[%c0_2, %c0_3], %15 {strides = array<i32>} : memref<8x128xf32, #tpu.memory_space<vmem>>, vector<8x128xf32>,
    return
  }
  func.func @transform_0(%arg0: i32) -> i32 {
    %c0_i32 = arith.constant 0 : i32
    %c0_i32_0 = arith.constant 0 : i32
    return %c0_i32 : i32
  }
  func.func @transform_1(%arg0: i32) -> (i32, i32) {
    %c0_i32 = arith.constant 0 : i32
    %c0_i32_0 = arith.constant 0 : i32
    return %arg0, %c0_i32 : i32, i32
  }
  func.func @transform_2(%arg0: i32) -> (i32, i32) {
    %c0_i32 = arith.constant 0 : i32
    %c0_i32_0 = arith.constant 0 : i32
    return %arg0, %c0_i32 : i32, i32
  }
}

</mosaic_0001>

<bundles_post_ra>
// kernel: tpu_custom_call.1
= control target key start
LH: loop header
LB: loop body
LE: loop exit
PB: predicated region body
PF: predicated region fallthrough
CT: control target
= control target key end

     0   :  { %7 = vsyncpa [#allocation5], 0  ;;  %s397_s0 = inlined_call_operand.hbm [shape: f32[4], index: 0, kind: input, shape index: {}]   ;;  %s398_s1 = inlined_call_operand.hbm [shape: f32[8,128], index: 1, kind: input, shape index: {}]   ;;  %s399_s2 = inlined_call_operand.hbm [shape: f32[8,128], index: 2, kind: output, shape index: {}]  }
   0x1   :  { %8 = vsyncpa [#allocation3], 0 }
   0x2   :  { %9 = vsyncpa [#allocation4], 0  ;;  %s15_s11 = sshll.u32 %s397_s0, 4  ;;  %s24_s14 = sshll.u32 %s398_s1, 4  ;;  %s16_s11 = int_to_ptr.hbm [resolvable:$true] %s15_s11  ;;  %s25_s14 = int_to_ptr.hbm [resolvable:$true] %s24_s14 }
   0x3   :  { %s309_s15 = smov [#allocation2]   ;;  %s310_s16 = smov [#allocation6]  }
   0x4   :  { %18 = dma.hbm_to_smem %s16_s11, 16, %s309_s15, [#allocation5]  }
   0x5   :  { %s26_s17 = sshll.u32 %s310_s16, 4  ;;  %s27_s17 = int_to_ptr.vmem [resolvable:$true] %s26_s17 }
   0x6   :  { %29 = dma.hbm_to_vmem [thread:$0]  %s25_s14, 128, %s27_s17, [#allocation3]  }
   0x7   :  { %303 = dma.done.wait [#allocation5], 16  }
   0x8   :  { %304 = vsyncadd [#allocation5], 4294967280 }
   0x9   :  { %305 = dma.done.wait [#allocation3], 128  }
   0xa   :  { %306 = vsyncadd [#allocation3], 4294967168 }
   0xb   :  { %38 = sfence }
   0xc   :  { %v340_v0 = vld [vmem:[#allocation6] sm:$0xff]  ;;  %v311_v12 = vmov 683565275   ;;  %v312_v14 = vmov 2475754826   ;;  %s230_s0 = sld [smem:[#allocation2 + $0x3]] }
   0xd   :  { %v43_v1 = vand.u32 2139095040, %v340_v0  ;;  %v40_v3 = vand.u32 2147483647, %v340_v0  ;;  %v313_v16 = vmov 2131351028   ;;  %vm42_vm12 = vcmp.lt.s32.totalorder %v340_v0, 0 }
   0xe   :  { %v314_v18 = vmov 2102212464   ;;  %v315_v20 = vmov 920167782   ;;  %v316_v26 = vmov 1326507024  }
   0xf   :  { %v44_v2 = vshrl.u32 %v43_v1, 23  ;;  %v47_v6 = vand.u32 8388607, %v40_v3  ;;  %v317_v1 = vmov 0   ;;  %vm384_vm13 = vcmp.le.f32.partialorder %v40_v3, 0.7853982 }
  0x10   :  { %s231_s1 = sld [smem:[#allocation2 + $0x2]]  ;;  %s318_s20 = smov [#allocation7]  }
  0x11   :  { %v227_v4 = vadd.s32 4294967169, %v44_v2  ;;  %v48_v9 = vor.u32 8388608, %v47_v6  ;;  %s232_s18 = sld [smem:[#allocation2 + $0x1]]  ;;  %s214_s21 = sshll.u32 %s318_s20, 4  ;;  %s215_s21 = int_to_ptr.vmem [resolvable:$true] %s214_s21 }
  0x12   :  { %s205_s19 = sld [smem:[#allocation2]]  ;;  %s216_s24 = sshll.u32 %s399_s2, 4  ;;  %s217_s24 = int_to_ptr.hbm [resolvable:$true] %s216_s24 }
  0x13   :  { %v50_v5 = vadd.s32 1, %v227_v4  ;;  %v349_v28 = vshll.u32 %v48_v9, 8 }
  0x15   :  { %vm51_vm0 = vcmp.gt.s32.totalorder %v50_v5, 0  ;;  %v89_v40 = vand.u32 65535, %v349_v28  ;;  %v90_v41 = vshrl.u32 %v349_v28, 16 }
  0x16   :  { %v52_v7 = vsel %vm51_vm0, %v50_v5, 0 }
  0x17   :  { %v54_v8 = vand.u32 31, %v52_v7  ;;  %v346_v10 = vshrl.u32 %v52_v7, 5 }
  0x19   :  { %v55_v11 = vsub.s32 32, %v54_v8  ;;  %v57_v13 = vshll.u32 %v311_v12, %v54_v8  ;;  %v60_v15 = vshll.u32 %v312_v14, %v54_v8  ;;  %v63_v17 = vshll.u32 %v313_v16, %v54_v8 }
  0x1a   :  { %v66_v19 = vshll.u32 %v314_v18, %v54_v8  ;;  %v69_v21 = vshll.u32 %v315_v20, %v54_v8  ;;  %vm72_vm1 = vcmp.lt.s32.totalorder %v346_v10, 1  ;;  %vm75_vm2 = vcmp.lt.s32.totalorder %v346_v10, 4 }
  0x1b   :  { %v58_v22 = vshrl.u32 %v312_v14, %v55_v11  ;;  %v61_v23 = vshrl.u32 %v313_v16, %v55_v11  ;;  %v64_v24 = vshrl.u32 %v314_v18, %v55_v11  ;;  %v67_v25 = vshrl.u32 %v315_v20, %v55_v11 }
  0x1c   :  { %v70_v27 = vshrl.u32 %v316_v26, %v55_v11  ;;  %vm74_vm3 = vcmp.lt.s32.totalorder %v346_v10, 3  ;;  %vm73_vm4 = vcmp.lt.s32.totalorder %v346_v10, 2  ;;  %v56_v48 = vshrl.u32 %v311_v12, %v55_v11 }
  0x1d   :  { %v59_v29 = vor.u32 %v58_v22, %v57_v13  ;;  %v62_v30 = vor.u32 %v61_v23, %v60_v15  ;;  %v65_v31 = vor.u32 %v64_v24, %v63_v17  ;;  %v68_v32 = vor.u32 %v67_v25, %v66_v19 }
  0x1e   :  { %v71_v33 = vor.u32 %v70_v27, %v69_v21 }
  0x1f   :  { %v80_v34 = vsel %vm72_vm1, %v59_v29, %v62_v30  ;;  %v84_v35 = vsel %vm72_vm1, %v62_v30, %v65_v31  ;;  %v81_v36 = vsel %vm75_vm2, %v68_v32, 920167782  ;;  %v76_v61 = vsel %vm72_vm1, %v56_v48, %v59_v29 }
  0x20   :  { %v85_v37 = vsel %vm75_vm2, %v71_v33, 1326507024  ;;  %v82_v38 = vsel %vm74_vm3, %v65_v31, %v81_v36  ;;  %v77_v63 = vsel %vm75_vm2, %v65_v31, 2102212464  ;;  %vm183_vm1 = vweird.f32 %v340_v0 }
  0x21   :  { %v86_v39 = vsel %vm74_vm3, %v68_v32, %v85_v37  ;;  %v83_v42 = vsel %vm73_vm4, %v80_v34, %v82_v38  ;;  %v78_v12 = vsel %vm74_vm3, %v62_v30, %v77_v63 }
  0x22   :  { %v87_v43 = vsel %vm73_vm4, %v84_v35, %v86_v39  ;;  %v113_v46 = vand.u32 65535, %v83_v42  ;;  %v114_v47 = vshrl.u32 %v83_v42, 16  ;;  %v79_v20 = vsel %vm73_vm4, %v76_v61, %v78_v12 }
  0x23   :  { %v91_v44 = vand.u32 65535, %v87_v43  ;;  %v92_v45 = vshrl.u32 %v87_v43, 16  ;;  %v133_v24 = vmul.u32 %v349_v28, %v79_v20  ;;  %v195_v12 = vstv %s230_s0 }
  0x24   :  { %v115_v52 = vmul.u32 %v113_v46, %v89_v40  ;;  %v116_v53 = vmul.u32 %v114_v47, %v89_v40  ;;  %v117_v54 = vmul.u32 %v113_v46, %v90_v41  ;;  %v118_v58 = vmul.u32 %v114_v47, %v90_v41 }
  0x25   :  { %v93_v49 = vmul.u32 %v91_v44, %v89_v40  ;;  %v94_v50 = vmul.u32 %v92_v45, %v89_v40  ;;  %v95_v51 = vmul.u32 %v91_v44, %v90_v41  ;;  %v96_v55 = vmul.u32 %v92_v45, %v90_v41 }
  0x26   :  { %v119_v59 = vshll.u32 %v116_v53, 16  ;;  %v121_v60 = vshll.u32 %v117_v54, 16  ;;  %v120_v9 = vshrl.u32 %v116_v53, 16  ;;  %v122_v16 = vshrl.u32 %v117_v54, 16 }
  0x27   :  { %v97_v56 = vshll.u32 %v94_v50, 16  ;;  %v99_v57 = vshll.u32 %v95_v51, 16  ;;  %v98_v5 = vshrl.u32 %v94_v50, 16  ;;  %v100_v13 = vshrl.u32 %v95_v51, 16 }
  0x28   :  { %vm123_vm6 = vc.u32 %v115_v52, %v119_v59  ;;  %v125_v4 = vadd.s32 %v119_v59, %v115_v52 }
  0x29   :  { %vm101_vm5 = vc.u32 %v93_v49, %v97_v56  ;;  %v103_v62 = vadd.s32 %v97_v56, %v93_v49  ;;  %v124_v7 = vsel %vm123_vm6, 1, %v317_v1 }
  0x2a   :  { %v102_v2 = vsel %vm101_vm5, 1, %v317_v1  ;;  %v126_v11 = vadd.s32 %v124_v7, %v118_v58  ;;  %vm127_vm8 = vc.u32 %v125_v4, %v121_v60  ;;  %v129_v19 = vadd.s32 %v125_v4, %v121_v60 }
  0x2b   :  { %v104_v6 = vadd.s32 %v102_v2, %v96_v55  ;;  %vm105_vm7 = vc.u32 %v103_v62, %v99_v57  ;;  %v128_v15 = vsel %vm127_vm8, 1, %v317_v1 }
  0x2c   :  { %v106_v8 = vsel %vm105_vm7, 1, %v317_v1  ;;  %v130_v17 = vadd.s32 %v128_v15, %v126_v11  ;;  %v198_v15 = vstv %s231_s1 }
  0x2d   :  { %v108_v14 = vadd.s32 %v106_v8, %v104_v6 }
  0x2e   :  { %v131_v21 = vadd.s32 %v130_v17, %v120_v9 }
  0x2f   :  { %v109_v18 = vadd.s32 %v108_v14, %v98_v5 }
  0x30   :  { %v132_v23 = vadd.s32 %v131_v21, %v122_v16  ;;  %v206_v21 = vstv %s205_s19 }
  0x31   :  { %v110_v22 = vadd.s32 %v109_v18, %v100_v13  ;;  %v202_v18 = vstv %s232_s18 }
  0x32   :  { %v136_v25 = vadd.s32 1, %v132_v23 }
  0x33   :  { %vm135_vm9 = vc.u32 %v110_v22, %v129_v19  ;;  %v134_v10 = vadd.s32 %v129_v19, %v110_v22 }
  0x34   :  { %v137_v26 = vsel %vm135_vm9, %v136_v25, %v132_v23 }
  0x35   :  { %v138_v27 = vadd.s32 %v137_v26, %v133_v24 }
  0x37   :  { %v139_v29 = vadd.s32 536870912, %v138_v27 }
  0x39   :  { %v140_v30 = vshrl.u32 %v139_v29, 30 }
  0x3b   :  { %v141_v31 = vshll.u32 %v140_v30, 30  ;;  %v164_v51 = vsub.s32 4, %v140_v30 }
  0x3d   :  { %v142_v32 = vsub.s32 %v138_v27, %v141_v31  ;;  %v165_v56 = vsel %vm42_vm12, %v164_v51, %v140_v30 }
  0x3e   :  { %v167_v59 = vsel %vm384_vm13, 0, %v165_v56 }
  0x3f   :  { %vm143_vm10 = vcmp.lt.s32.totalorder %v142_v32, 0  ;;  %v144_v33 = vsub.s32 0, %v142_v32  ;;  %v184_v63 = vand.u32 3, %v167_v59 }
  0x41   :  { %v145_v34 = vsel %vm143_vm10, %v144_v33, %v142_v32  ;;  %vm189_vm14 = vcmp.eq.s32.totalorder %v184_v63, 2  ;;  %vm186_vm15 = vcmp.eq.s32.totalorder %v184_v63, 0  ;;  %vm185_vm0 = vcmp.lt.s32.totalorder %v184_v63, 2 }
  0x42   :  { %v146_v35 = vclz %v145_v34 }
  0x44   :  { %v228_v36 = vadd.s32 4294967294, %v146_v35 }
  0x46   :  { %vm229_vm11 = vcmp.lt.s32.totalorder %v228_v36, 0 }
  0x47   :  { %v149_v37 = vsel %vm229_vm11, 0, %v228_v36 }
  0x48   :  { %v150_v38 = vsub.s32 32, %v149_v37  ;;  %v151_v39 = vshll.u32 %v142_v32, %v149_v37  ;;  %v154_v40 = vsub.s32 4294967266, %v149_v37 }
  0x4a   :  { %v152_v28 = vshrl.u32 %v134_v10, %v150_v38  ;;  %v155_v41 = vadd.s32 127, %v154_v40 }
  0x4c   :  { %v153_v42 = vor.u32 %v152_v28, %v151_v39  ;;  %v156_v43 = vshll.u32 %v155_v41, 23 }
  0x4e   :  { %v157_v44 = vor.u32 4788187, %v156_v43  ;;  %v160_v45 = vcvt.s32.f32 %v153_v42 }
  0x50   :  { %v158_v46 = vand.u32 2147483647, %v157_v44 }
  0x52   :  { %v161_v47 = vmul.f32 %v160_v45, %v158_v46 }
  0x54   :  { %v162_v49 = vxor.u32 2147483648, %v161_v47 }
  0x56   :  { %v163_v50 = vsel %vm42_vm12, %v162_v49, %v161_v47 }
  0x57   :  { %v166_v52 = vsel %vm384_vm13, %v340_v0, %v163_v50 }
  0x58   :  { %v168_v53 = vmul.f32 %v166_v52, %v166_v52 }
  0x5a   :  { %v169_v54 = vmul.f32 -0.001358992, %v168_v53  ;;  %v176_v55 = vmul.f32 -0.00019511016, %v168_v53 }
  0x5c   :  { %v170_v57 = vadd.f32 0.041655596, %v169_v54  ;;  %v177_v58 = vadd.f32 0.008332121, %v176_v55 }
  0x5e   :  { %v171_v3 = vmul.f32 %v170_v57, %v168_v53  ;;  %v178_v60 = vmul.f32 %v177_v58, %v168_v53 }
  0x60   :  { %v172_v61 = vadd.f32 -0.4999988, %v171_v3  ;;  %v179_v62 = vadd.f32 -0.16666654, %v178_v60 }
  0x62   :  { %v173_v1 = vmul.f32 %v172_v61, %v168_v53  ;;  %v180_v2 = vmul.f32 %v179_v62, %v168_v53 }
  0x64   :  { %v174_v4 = vadd.f32 1.0, %v173_v1  ;;  %v181_v5 = vadd.f32 1.0, %v180_v2 }
  0x66   :  { %v182_v6 = vmul.f32 %v181_v5, %v166_v52  ;;  %v190_v7 = vxor.u32 2147483648, %v174_v4 }
  0x68   :  { %v187_v8 = vxor.u32 2147483648, %v182_v6  ;;  %v191_v9 = vsel %vm189_vm14, %v190_v7, %v182_v6 }
  0x6a   :  { %v188_v11 = vsel %vm186_vm15, %v174_v4, %v187_v8 }
  0x6b   :  { %v192_v13 = vsel %vm185_vm0, %v188_v11, %v191_v9 }
  0x6c   :  { %v193_v14 = vsel %vm183_vm1, nan, %v192_v13 }
  0x6d   :  { %v196_v16 = vmul.f32 %v195_v12, %v193_v14 }
  0x6f   :  { %v199_v17 = vadd.f32 %v198_v15, %v196_v16 }
  0x71   :  { %v200_v19 = vmul.f32 %v199_v17, %v193_v14 }
  0x73   :  { %v203_v20 = vadd.f32 %v202_v18, %v200_v19 }
  0x75   :  { %v204_v22 = vmul.f32 %v203_v20, %v193_v14 }
  0x77   :  { %v207_v0 = vadd.f32 %v206_v21, %v204_v22 }
  0x79   :  { %208 = vst [vmem:[#allocation7] sm:$0xff] %v207_v0 }
  0x7a   :  { %219 = dma.vmem_to_hbm [thread:$0]  %s215_s21, 128, %s217_s24, [#allocation4]  }
  0x7b   :  { %307 = dma.done.wait [#allocation4], 128  }
  0x7c   :  { %308 = vsyncadd [#allocation4], 4294967168 }
  0x7d   :  { %224 = vsyncpa [#allocation3], 1 }
  0x7e   :  { %225 = vsyncpa [#allocation4], 1 }
  0x7f   :  { %226 = vsyncpa [#allocation5], 1 }

</bundles_post_ra>
